<compile_context>
chip_gen: v7x
topology: tpu7x:2x2x1
jax: 0.10.0
libtpu: 0.0.40
codegen_flags: <defaults>
</compile_context>

<pallas_src>
import functools

import jax
import jax.numpy as jnp
from jax.experimental import pallas as pl
from jax.experimental.pallas import tpu as pltpu


# ----------------------------- helpers --------------------------------------


def _layernorm(x, g, b, eps=1e-5):
    """f32 LayerNorm over the last dim (biased variance, matches PyTorch)."""
    mu = jnp.mean(x, axis=-1, keepdims=True)
    var = jnp.mean((x - mu) ** 2, axis=-1, keepdims=True)
    return (x - mu) * jax.lax.rsqrt(var + eps) * g + b


def _is_v7x():
    try:
        kind = jax.devices()[0].device_kind.lower().replace(" ", "")
    except Exception:
        return False
    return ("v7" in kind) or ("tpu7" in kind)


def _vmem_limit_bytes():
    """Chip-aware scoped-VMEM request: 64 MiB on v5e/v6e, ~48 MiB on v7x."""
    try:
        cap = int(getattr(pltpu.get_tpu_info(), "vmem_capacity_bytes",
                          128 * 1024 * 1024))
    except Exception:
        cap = 128 * 1024 * 1024
    return min(64 * 1024 * 1024, (cap * 3) // 4)


def _choose_block_b(B, S, per_batch_bytes, fixed_bytes, budget, target_tokens=512):
    """Pick a batch tile Bt (divisor of B): >=512 tokens per block when the VMEM
    budget allows, while preferring a grid of >=2 steps (megacore / 2 TCs)."""
    divs = [d for d in range(1, B + 1) if B % d == 0]
    fits = [d for d in divs if fixed_bytes + d * per_batch_bytes <= budget] or [1]
    cands = [d for d in fits if d * S >= target_tokens]
    if cands:
        bt = cands[0]
        if bt == B:
            smaller = [d for d in fits if d < B and d * S >= target_tokens // 2]
            if smaller:
                bt = smaller[-1]
        return bt
    bt = fits[-1]
    if bt == B and len(fits) >= 2:
        bt = fits[-2]
    return bt


def _choose_block_h(H4, D, budget, weight_bufs):
    """Hidden-dim tile for the MLP: keep weights fully resident when they fit
    (v5e/v6e at ViT scales), otherwise tile (v7x / very large D)."""
    weight_bytes = weight_bufs * (D * H4 + H4 * D) * 2        # bf16
    if weight_bytes <= budget // 2:
        return H4
    for th in (1024, 512, 256, 128):
        if th < H4 and H4 % th == 0:
            return th
    return H4


def _const_spec(shape, index_map, single_buffer):
    """BlockSpec for grid-invariant blocks; single-buffer on v7x to save VMEM."""
    if single_buffer:
        try:
            return pl.BlockSpec(shape, index_map, pipeline_mode=pl.Buffered(1))
        except Exception:
            pass
    return pl.BlockSpec(shape, index_map)


# ----------------------------- kernels --------------------------------------


def attn_block_kernel(x_ref, g1_ref, b1_ref, w_in_ref, b_in_ref,
                      w_out_ref, b_out_ref, o_ref, qkv_ref, ao_ref, *, n_head):
    """out = x + out_proj(MHA(LN1(x))) for a (Bt, S, D) block.

    qkv_ref : (Bt, S, 3D) bf16 VMEM scratch (fused in-projection result)
    ao_ref  : (Bt, S, D)  bf16 VMEM scratch (per-head attention outputs)
    """
    Bt, S, D = x_ref.shape
    hd = D // n_head

    # LayerNorm (f32 stats) + fused in-projection on the bf16 MXU path.
    # The 1/sqrt(hd) scale is already folded into the Q slice of w_in / b_in.
    xf = x_ref[...].reshape(Bt * S, D)
    h = _layernorm(xf, g1_ref[...], b1_ref[...])
    qkv = jnp.dot(h.astype(jnp.bfloat16), w_in_ref[...],
                  preferred_element_type=jnp.float32) + b_in_ref[...]
    qkv_ref[...] = qkv.reshape(Bt, S, 3 * D).astype(jnp.bfloat16)

    def batch_body(bb, carry):
        # Static loop over heads; q/k/v are zero-cost ref slices, so the live
        # set per head is just the (S, S) f32 scores + (S, hd) pv.
        for hh in range(n_head):
            lo = hh * hd
            qh = qkv_ref[bb, :, lo:lo + hd]                       # (S, hd) bf16
            kh = qkv_ref[bb, :, D + lo:D + lo + hd]
            vh = qkv_ref[bb, :, 2 * D + lo:2 * D + lo + hd]

            # contract matching last dims -> no kh.T (no XLU transpose)
            s = jax.lax.dot_general(qh, kh, (((1,), (1,)), ((), ())),
                                    preferred_element_type=jnp.float32)  # (S, S)
            s = s - jnp.max(s, axis=-1, keepdims=True)
            p = jnp.exp(s)
            p = p * pl.reciprocal(jnp.sum(p, axis=-1, keepdims=True), approx=True)

            pv = jnp.dot(p.astype(jnp.bfloat16), vh,
                         preferred_element_type=jnp.float32)             # (S, hd)
            ao_ref[bb, :, lo:lo + hd] = pv.astype(jnp.bfloat16)
        return carry

    jax.lax.fori_loop(0, Bt, batch_body, 0)

    # Single output projection over all heads/batch rows: K = D fills the MXU.
    out = jnp.dot(ao_ref[...].reshape(Bt * S, D), w_out_ref[...],
                  preferred_element_type=jnp.float32) + b_out_ref[...]
    o_ref[...] = (x_ref[...] + out.reshape(Bt, S, D)).astype(o_ref.dtype)


def mlp_full_kernel(x_ref, g2_ref, b2_ref, w_fc_ref, b_fc_ref,
                    w_proj_ref, b_proj_ref, o_ref):
    """out = x + c_proj(QuickGELU(c_fc(LN2(x)))), weights fully VMEM-resident."""
    Bt, S, D = x_ref.shape
    xf = x_ref[...].reshape(Bt * S, D)
    h = _layernorm(xf, g2_ref[...], b2_ref[...])
    h = jnp.dot(h.astype(jnp.bfloat16), w_fc_ref[...],
                preferred_element_type=jnp.float32) + b_fc_ref[...]
    h = h * jax.nn.sigmoid(1.702 * h)                 # QuickGELU in f32
    out = jnp.dot(h.astype(jnp.bfloat16), w_proj_ref[...],
                  preferred_element_type=jnp.float32) + b_proj_ref[...]
    o_ref[...] = (x_ref[...] + out.reshape(Bt, S, D)).astype(o_ref.dtype)


def mlp_tiled_kernel(x_ref, g2_ref, b2_ref, w_fc_ref, b_fc_ref,
                     w_proj_ref, b_proj_ref, o_ref, hln_ref, acc_ref):
    """Same op, hidden dim (4*D) tiled on a reduction grid axis (large D / v7x)."""
    k = pl.program_id(1)
    Bt, S, D = x_ref.shape

    @pl.when(k == 0)
    def _():
        xf = x_ref[...].reshape(Bt * S, D)
        hln_ref[...] = _layernorm(xf, g2_ref[...], b2_ref[...]).astype(jnp.bfloat16)
        acc_ref[...] = jnp.zeros_like(acc_ref)

    h = jnp.dot(hln_ref[...], w_fc_ref[...],
                preferred_element_type=jnp.float32) + b_fc_ref[...]
    h = h * jax.nn.sigmoid(1.702 * h)
    acc_ref[...] += jnp.dot(h.astype(jnp.bfloat16), w_proj_ref[...],
                            preferred_element_type=jnp.float32)

    @pl.when(k == pl.num_programs(1) - 1)
    def _():
        out = acc_ref[...] + b_proj_ref[...]
        o_ref[...] = (x_ref[...] + out.reshape(Bt, S, D)).astype(o_ref.dtype)


# ----------------------------- parameters -----------------------------------


def prepare_params(params, n_head):
    """One-time parameter prep: transpose weights to (in, out), cast to bf16 for
    the MXU, fold the 1/sqrt(hd) attention scale into the Q rows of the
    in-projection, reshape biases / LN params to (1, dim) f32."""
    f32, bf16 = jnp.float32, jnp.bfloat16
    D = params['out_proj_weight'].shape[0]
    hd = D // n_head
    scale = 1.0 / (hd ** 0.5)

    w_in = params['in_proj_weight'].T.astype(f32)                 # (D, 3D)
    b_in = params['in_proj_bias'].astype(f32)                     # (3D,)
    w_in = w_in.at[:, :D].multiply(scale)                         # fold Q scale
    b_in = b_in.at[:D].multiply(scale)

    return {
        'ln1_g': params['ln1_g'].astype(f32).reshape(1, D),
        'ln1_b': params['ln1_b'].astype(f32).reshape(1, D),
        'ln2_g': params['ln2_g'].astype(f32).reshape(1, D),
        'ln2_b': params['ln2_b'].astype(f32).reshape(1, D),
        'w_in': w_in.astype(bf16),                                # (D, 3D)
        'b_in': b_in.reshape(1, 3 * D),
        'w_out': params['out_proj_weight'].T.astype(bf16),        # (D, D)
        'b_out': params['out_proj_bias'].astype(f32).reshape(1, D),
        'w_fc': params['c_fc_weight'].T.astype(bf16),             # (D, 4D)
        'b_fc': params['c_fc_bias'].astype(f32).reshape(1, 4 * D),
        'w_proj': params['c_proj_weight'].T.astype(bf16),         # (4D, D)
        'b_proj': params['c_proj_bias'].astype(f32).reshape(1, D),
    }


# ----------------------------- wrapper --------------------------------------


def residual_attention_block(x, prep, *, n_head, mode='attention',
                             block_b=None, block_h=None, seq_first=False,
                             alias_input=False):
    """x: (B, S, D) if seq_first=False (recommended, no transposes), else
    (S, B, D) (PyTorch nn.MultiheadAttention batch_first=False layout)."""
    if seq_first:
        S, B, D = x.shape
        xb = jnp.transpose(x, (1, 0, 2))
    else:
        B, S, D = x.shape
        xb = x

    vmem_limit = _vmem_limit_bytes()
    budget = int(vmem_limit * 0.8)
    sb_consts = _is_v7x()                    # single-buffer invariant blocks on v7x
    wbuf = 1 if sb_consts else 2

    if mode == 'attention':
        # x/out f32 double-buffered + qkv/ao bf16 scratches + live headroom
        per_b = 44 * S * D
        fixed = (3 * D * D + D * D) * 2 * wbuf + (64 << 10)
        Bt = block_b if block_b is not None else _choose_block_b(B, S, per_b, fixed, budget)
        assert B % Bt == 0
        nb = B // Bt

        kernel = functools.partial(attn_block_kernel, n_head=n_head)
        args = (xb, prep['ln1_g'], prep['ln1_b'], prep['w_in'], prep['b_in'],
                prep['w_out'], prep['b_out'])
        x_spec = pl.BlockSpec((Bt, S, D), lambda i: (i, 0, 0))
        in_specs = [
            x_spec,
            _const_spec((1, D), lambda i: (0, 0), sb_consts),
            _const_spec((1, D), lambda i: (0, 0), sb_consts),
            _const_spec((D, 3 * D), lambda i: (0, 0), sb_consts),
            _const_spec((1, 3 * D), lambda i: (0, 0), sb_consts),
            _const_spec((D, D), lambda i: (0, 0), sb_consts),
            _const_spec((1, D), lambda i: (0, 0), sb_consts),
        ]
        out_specs = x_spec
        grid = (nb,)
        scratch_shapes = (pltpu.VMEM((Bt, S, 3 * D), jnp.bfloat16),   # qkv
                          pltpu.VMEM((Bt, S, D), jnp.bfloat16))       # per-head out
        dims = ("parallel",)
        flops = 2 * B * S * D * (3 * D) + 4 * B * S * S * D + 2 * B * S * D * D
        transcendentals = B * n_head * S * S + 2 * B * S
        bytes_accessed = (2 * B * S * D * 4
                          + nb * (3 * D * D + D * D) * 2
                          + (5 * D + 3 * D) * 4)

    elif mode == 'mlp':
        H4 = 4 * D
        tH = block_h if block_h is not None else _choose_block_h(H4, D, budget, wbuf)
        assert H4 % tH == 0
        nH = H4 // tH

        if nH == 1:
            per_b = 56 * S * D
            fixed = 8 * D * D * 2 * wbuf + (64 << 10)
        else:
            per_b = 30 * S * D + 8 * S * tH
            fixed = 2 * (D * tH + tH * D) * 2 + (64 << 10)
        Bt = block_b if block_b is not None else _choose_block_b(B, S, per_b, fixed, budget)
        assert B % Bt == 0
        nb = B // Bt

        args = (xb, prep['ln2_g'], prep['ln2_b'], prep['w_fc'], prep['b_fc'],
                prep['w_proj'], prep['b_proj'])
        flops = 16 * B * S * D * D
        transcendentals = 4 * B * S * D + B * S
        bytes_accessed = 2 * B * S * D * 4 + nb * 8 * D * D * 2 + 6 * D * 4

        if nH == 1:
            kernel = mlp_full_kernel
            x_spec = pl.BlockSpec((Bt, S, D), lambda i: (i, 0, 0))
            in_specs = [
                x_spec,
                _const_spec((1, D), lambda i: (0, 0), sb_consts),
                _const_spec((1, D), lambda i: (0, 0), sb_consts),
                _const_spec((D, H4), lambda i: (0, 0), sb_consts),
                _const_spec((1, H4), lambda i: (0, 0), sb_consts),
                _const_spec((H4, D), lambda i: (0, 0), sb_consts),
                _const_spec((1, D), lambda i: (0, 0), sb_consts),
            ]
            out_specs = x_spec
            grid = (nb,)
            scratch_shapes = ()
            dims = ("parallel",)
        else:
            kernel = mlp_tiled_kernel
            x_spec = pl.BlockSpec((Bt, S, D), lambda i, k: (i, 0, 0))
            in_specs = [
                x_spec,
                _const_spec((1, D), lambda i, k: (0, 0), sb_consts),
                _const_spec((1, D), lambda i, k: (0, 0), sb_consts),
                pl.BlockSpec((D, tH), lambda i, k: (0, k)),
                pl.BlockSpec((1, tH), lambda i, k: (0, k)),
                pl.BlockSpec((tH, D), lambda i, k: (k, 0)),
                _const_spec((1, D), lambda i, k: (0, 0), sb_consts),
            ]
            out_specs = x_spec
            grid = (nb, nH)
            scratch_shapes = (pltpu.VMEM((Bt * S, D), jnp.bfloat16),  # cached LN(x)
                              pltpu.VMEM((Bt * S, D), jnp.float32))   # f32 accumulator
            dims = ("parallel", "arbitrary")
    else:
        raise ValueError(mode)

    call_kwargs = {}
    if alias_input:
        # reuse x's HBM buffer for the output (donates x); off by default so the
        # caller may keep using x after the call.
        call_kwargs['input_output_aliases'] = {0: 0}

    out = pl.pallas_call(
        kernel,
        out_shape=jax.ShapeDtypeStruct((B, S, D), xb.dtype),
        grid=grid,
        in_specs=in_specs,
        out_specs=out_specs,
        scratch_shapes=scratch_shapes,
        compiler_params=pltpu.CompilerParams(
            dimension_semantics=dims,
            vmem_limit_bytes=vmem_limit),
        cost_estimate=pl.CostEstimate(
            flops=int(flops), transcendentals=int(transcendentals),
            bytes_accessed=int(bytes_accessed)),
        **call_kwargs,
    )(*args)

    return jnp.transpose(out, (1, 0, 2)) if seq_first else out


# --------------------------- pure-JAX reference ------------------------------


def _ref_attention(x, p, n_head):
    S, B, D = x.shape
    hd = D // n_head
    h = _layernorm(x, p['ln1_g'], p['ln1_b'])
    qkv = jnp.einsum('sbd,ed->sbe', h, p['in_proj_weight']) + p['in_proj_bias']
    q, k, v = qkv[..., :D], qkv[..., D:2 * D], qkv[..., 2 * D:]

    def heads(t):  # (S,B,D) -> (B,H,S,hd)
        return jnp.transpose(t.reshape(S, B, n_head, hd), (1, 2, 0, 3))

    q, k, v = heads(q) / (hd ** 0.5), heads(k), heads(v)
    s = jnp.einsum('bhqd,bhkd->bhqk', q, k)
    pw = jax.nn.softmax(s, axis=-1)
    o = jnp.einsum('bhqk,bhkd->bhqd', pw, v)
    o = jnp.transpose(o, (2, 0, 1, 3)).reshape(S, B, D)
    o = jnp.einsum('sbd,ed->sbe', o, p['out_proj_weight']) + p['out_proj_bias']
    return x + o


def _ref_mlp(x, p):
    h = _layernorm(x, p['ln2_g'], p['ln2_b'])
    h = jnp.einsum('sbd,ed->sbe', h, p['c_fc_weight']) + p['c_fc_bias']
    h = h * jax.nn.sigmoid(1.702 * h)
    h = jnp.einsum('sbe,de->sbd', h, p['c_proj_weight']) + p['c_proj_bias']
    return x + h


def _make_params(key, D):
    ks = jax.random.split(key, 8)
    return {
        'in_proj_weight': 0.1 * jax.random.normal(ks[0], (3 * D, D), jnp.float32),
        'in_proj_bias':   0.1 * jax.random.normal(ks[1], (3 * D,), jnp.float32),
        'out_proj_weight': 0.1 * jax.random.normal(ks[2], (D, D), jnp.float32),
        'out_proj_bias':   0.1 * jax.random.normal(ks[3], (D,), jnp.float32),
        'c_fc_weight':   0.1 * jax.random.normal(ks[4], (4 * D, D), jnp.float32),
        'c_fc_bias':     0.1 * jax.random.normal(ks[5], (4 * D,), jnp.float32),
        'c_proj_weight': 0.1 * jax.random.normal(ks[6], (D, 4 * D), jnp.float32),
        'c_proj_bias':   0.1 * jax.random.normal(ks[7], (D,), jnp.float32),
        'ln1_g': jnp.ones((D,), jnp.float32), 'ln1_b': jnp.zeros((D,), jnp.float32),
        'ln2_g': jnp.ones((D,), jnp.float32), 'ln2_b': jnp.zeros((D,), jnp.float32),
    }


# ------------------------------- main ----------------------------------------


if __name__ == "__main__":
    root = jax.random.PRNGKey(0)
    k_p1, k_x1, k_p2, k_x2 = jax.random.split(root, 4)

    # ---- Test 1: PyTorch (seq, batch, d_model) layout; attention + full MLP ----
    S, B, D, H = 8, 2, 32, 4
    params = _make_params(k_p1, D)
    prep = prepare_params(params, n_head=H)
    x = jax.random.normal(k_x1, (S, B, D), jnp.float32)

    out_attn = residual_attention_block(x, prep, n_head=H, mode='attention',
                                        seq_first=True)
    out_mlp = residual_attention_block(x, prep, n_head=H, mode='mlp',
                                       seq_first=True)
    jax.block_until_ready((out_attn, out_mlp))

    ref_attn = _ref_attention(x, params, H)
    ref_mlp = _ref_mlp(x, params)
    assert jnp.allclose(out_attn, ref_attn, atol=2e-2, rtol=2e-2), "attention mismatch"
    assert jnp.allclose(out_mlp, ref_mlp, atol=2e-2, rtol=2e-2), "mlp mismatch"

    # ---- Test 2: batch-first layout, hidden-dim-tiled MLP path (accumulator) ----
    S2, B2, D2, H2 = 16, 2, 128, 4
    params2 = _make_params(k_p2, D2)
    prep2 = prepare_params(params2, n_head=H2)
    x2 = jax.random.normal(k_x2, (B2, S2, D2), jnp.float32)       # (B, S, D)

    out_mlp2 = residual_attention_block(x2, prep2, n_head=H2, mode='mlp',
                                        seq_first=False, block_h=128)
    jax.block_until_ready(out_mlp2)

    ref_mlp2 = jnp.transpose(_ref_mlp(jnp.transpose(x2, (1, 0, 2)), params2),
                             (1, 0, 2))
    assert jnp.allclose(out_mlp2, ref_mlp2, atol=2e-2, rtol=2e-2), "tiled mlp mismatch"

    print("KERNEL_OK")
</pallas_src>

<mosaic_0001>
module attributes {stable_mosaic.version = 11 : i64} {
  func.func @attn_block_kernel(%arg0: i32, %arg1: memref<1x8x32xf32, #tpu.memory_space<vmem>>, %arg2: memref<1x32xf32, #tpu.memory_space<vmem>>, %arg3: memref<1x32xf32, #tpu.memory_space<vmem>>, %arg4: memref<32x96xbf16, #tpu.memory_space<vmem>>, %arg5: memref<1x96xf32, #tpu.memory_space<vmem>>, %arg6: memref<32x32xbf16, #tpu.memory_space<vmem>>, %arg7: memref<1x32xf32, #tpu.memory_space<vmem>>, %arg8: memref<1x8x32xf32, #tpu.memory_space<vmem>>, %arg9: memref<1x8x96xbf16, #tpu.memory_space<vmem>>, %arg10: memref<1x8x32xbf16, #tpu.memory_space<vmem>>) attributes {dimension_semantics = [#tpu.dimension_semantics<parallel>], iteration_bounds = array<i64: 2>, scalar_prefetch = 0 : i64, scratch_operands = 2 : i64, tpu.core_type = #tpu.core_type<tc>, window_params = [{transform_indices = @transform_0, window_bounds = array<i64: 1, 8, 32>}, {pipeline_mode = #tpu.pipeline_mode<synchronous>, transform_indices = @transform_1, window_bounds = array<i64: 1, 32>}, {pipeline_mode = #tpu.pipeline_mode<synchronous>, transform_indices = @transform_2, window_bounds = array<i64: 1, 32>}, {pipeline_mode = #tpu.pipeline_mode<synchronous>, transform_indices = @transform_3, window_bounds = array<i64: 32, 96>}, {pipeline_mode = #tpu.pipeline_mode<synchronous>, transform_indices = @transform_4, window_bounds = array<i64: 1, 96>}, {pipeline_mode = #tpu.pipeline_mode<synchronous>, transform_indices = @transform_5, window_bounds = array<i64: 32, 32>}, {pipeline_mode = #tpu.pipeline_mode<synchronous>, transform_indices = @transform_6, window_bounds = array<i64: 1, 32>}, {transform_indices = @transform_7, window_bounds = array<i64: 1, 8, 32>}]} {
    %c0 = arith.constant 0 : index
    %c0_0 = arith.constant 0 : index
    %c0_1 = arith.constant 0 : index
    %0 = vector.load %arg1[%c0, %c0_0, %c0_1] : memref<1x8x32xf32, #tpu.memory_space<vmem>>, vector<1x8x32xf32>
    %1 = vector.shape_cast %0 : vector<1x8x32xf32> to vector<8x32xf32>
    %c0_2 = arith.constant 0 : index
    %c0_3 = arith.constant 0 : index
    %2 = vector.load %arg2[%c0_2, %c0_3] : memref<1x32xf32, #tpu.memory_space<vmem>>, vector<1x32xf32>
    %c0_4 = arith.constant 0 : index
    %c0_5 = arith.constant 0 : index
    %3 = vector.load %arg3[%c0_4, %c0_5] : memref<1x32xf32, #tpu.memory_space<vmem>>, vector<1x32xf32>
    %cst = arith.constant dense<0.000000e+00> : vector<8xf32>
    %4 = vector.multi_reduction <add>, %1, %cst [1] : vector<8x32xf32> to vector<8xf32>
    %5 = vector.shape_cast %4 : vector<8xf32> to vector<8x1xf32>
    %cst_6 = arith.constant 3.200000e+01 : f32
    %6 = vector.broadcast %cst_6 : f32 to vector<8x1xf32>
    %7 = arith.divf %5, %6 : vector<8x1xf32>
    %8 = vector.broadcast %7 : vector<8x1xf32> to vector<8x32xf32>
    %9 = arith.subf %1, %8 : vector<8x32xf32>
    %10 = arith.mulf %9, %9 : vector<8x32xf32>
    %cst_7 = arith.constant dense<0.000000e+00> : vector<8xf32>
    %11 = vector.multi_reduction <add>, %10, %cst_7 [1] : vector<8x32xf32> to vector<8xf32>
    %12 = vector.shape_cast %11 : vector<8xf32> to vector<8x1xf32>
    %cst_8 = arith.constant 3.200000e+01 : f32
    %13 = vector.broadcast %cst_8 : f32 to vector<8x1xf32>
    %14 = arith.divf %12, %13 : vector<8x1xf32>
    %15 = vector.broadcast %7 : vector<8x1xf32> to vector<8x32xf32>
    %16 = arith.subf %1, %15 : vector<8x32xf32>
    %cst_9 = arith.constant 9.99999974E-6 : f32
    %17 = vector.broadcast %cst_9 : f32 to vector<8x1xf32>
    %18 = arith.addf %14, %17 : vector<8x1xf32>
    %19 = math.rsqrt %18 : vector<8x1xf32>
    %20 = vector.broadcast %19 : vector<8x1xf32> to vector<8x32xf32>
    %21 = arith.mulf %16, %20 : vector<8x32xf32>
    %22 = vector.broadcast %2 : vector<1x32xf32> to vector<8x32xf32>
    %23 = arith.mulf %21, %22 : vector<8x32xf32>
    %24 = vector.broadcast %3 : vector<1x32xf32> to vector<8x32xf32>
    %25 = arith.addf %23, %24 : vector<8x32xf32>
    %26 = arith.truncf %25 : vector<8x32xf32> to vector<8x32xbf16>
    %c0_10 = arith.constant 0 : index
    %c0_11 = arith.constant 0 : index
    %27 = vector.load %arg4[%c0_10, %c0_11] : memref<32x96xbf16, #tpu.memory_space<vmem>>, vector<32x96xbf16>
    %cst_12 = arith.constant dense<0.000000e+00> : vector<8x96xf32>
    %28 = tpu.matmul %26, %27, %cst_12 {dimension_numbers = #tpu.dot_dimension_numbers<[1], [0], [0], [1], [0, 0, 1, 1], [], []>} : vector<8x32xbf16>, vector<32x96xbf16>, vector<8x96xf32> -> vector<8x96xf32>
    %c0_13 = arith.constant 0 : index
    %c0_14 = arith.constant 0 : index
    %29 = vector.load %arg5[%c0_13, %c0_14] : memref<1x96xf32, #tpu.memory_space<vmem>>, vector<1x96xf32>
    %30 = vector.broadcast %29 : vector<1x96xf32> to vector<8x96xf32>
    %31 = arith.addf %28, %30 : vector<8x96xf32>
    %32 = vector.shape_cast %31 : vector<8x96xf32> to vector<1x8x96xf32>
    %33 = arith.truncf %32 : vector<1x8x96xf32> to vector<1x8x96xbf16>
    %c0_15 = arith.constant 0 : index
    %c0_16 = arith.constant 0 : index
    %c0_17 = arith.constant 0 : index
    %34 = vector.load %arg9[%c0_15, %c0_16, %c0_17] : memref<1x8x96xbf16, #tpu.memory_space<vmem>>, vector<1x8x96xbf16>
    tpu.vector_store %arg9[%c0_15, %c0_16, %c0_17], %33 {strides = array<i32>} : memref<1x8x96xbf16, #tpu.memory_space<vmem>>, vector<1x8x96xbf16>,
    %c0_i32 = arith.constant 0 : i32
    %35 = arith.index_cast %c0_i32 : i32 to index
    %c0_18 = arith.constant 0 : index
    %c0_19 = arith.constant 0 : index
    %36 = vector.load %arg9[%35, %c0_18, %c0_19] : memref<1x8x96xbf16, #tpu.memory_space<vmem>>, vector<1x8x8xbf16>
    %37 = vector.shape_cast %36 : vector<1x8x8xbf16> to vector<8x8xbf16>
    %38 = arith.index_cast %c0_i32 : i32 to index
    %c0_20 = arith.constant 0 : index
    %c32 = arith.constant 32 : index
    %39 = vector.load %arg9[%38, %c0_20, %c32] : memref<1x8x96xbf16, #tpu.memory_space<vmem>>, vector<1x8x8xbf16>
    %40 = vector.shape_cast %39 : vector<1x8x8xbf16> to vector<8x8xbf16>
    %41 = arith.index_cast %c0_i32 : i32 to index
    %c0_21 = arith.constant 0 : index
    %c64 = arith.constant 64 : index
    %42 = vector.load %arg9[%41, %c0_21, %c64] : memref<1x8x96xbf16, #tpu.memory_space<vmem>>, vector<1x8x8xbf16>
    %43 = vector.shape_cast %42 : vector<1x8x8xbf16> to vector<8x8xbf16>
    %cst_22 = arith.constant dense<0.000000e+00> : vector<8x8xf32>
    %44 = tpu.matmul %37, %40, %cst_22 {dimension_numbers = #tpu.dot_dimension_numbers<[1], [1], [0], [0], [0, 0, 1, 0], [], []>} : vector<8x8xbf16>, vector<8x8xbf16>, vector<8x8xf32> -> vector<8x8xf32>
    %cst_23 = arith.constant dense<0xFF800000> : vector<8xf32>
    %45 = vector.multi_reduction <maximumf>, %44, %cst_23 [1] : vector<8x8xf32> to vector<8xf32>
    %46 = vector.shape_cast %45 : vector<8xf32> to vector<8x1xf32>
    %47 = vector.broadcast %46 : vector<8x1xf32> to vector<8x8xf32>
    %48 = arith.subf %44, %47 : vector<8x8xf32>
    %49 = math.exp %48 : vector<8x8xf32>
    %cst_24 = arith.constant dense<0.000000e+00> : vector<8xf32>
    %50 = vector.multi_reduction <add>, %49, %cst_24 [1] : vector<8x8xf32> to vector<8xf32>
    %51 = vector.shape_cast %50 : vector<8xf32> to vector<8x1xf32>
    %52 = tpu.reciprocal %51 {approx = true} : vector<8x1xf32> -> vector<8x1xf32>
    %53 = vector.broadcast %52 : vector<8x1xf32> to vector<8x8xf32>
    %54 = arith.mulf %49, %53 : vector<8x8xf32>
    %55 = arith.truncf %54 : vector<8x8xf32> to vector<8x8xbf16>
    %cst_25 = arith.constant dense<0.000000e+00> : vector<8x8xf32>
    %56 = tpu.matmul %55, %43, %cst_25 {dimension_numbers = #tpu.dot_dimension_numbers<[1], [0], [0], [1], [0, 0, 1, 1], [], []>} : vector<8x8xbf16>, vector<8x8xbf16>, vector<8x8xf32> -> vector<8x8xf32>
    %57 = arith.truncf %56 : vector<8x8xf32> to vector<8x8xbf16>
    %58 = arith.index_cast %c0_i32 : i32 to index
    %c0_26 = arith.constant 0 : index
    %c0_27 = arith.constant 0 : index
    %59 = vector.load %arg10[%58, %c0_26, %c0_27] : memref<1x8x32xbf16, #tpu.memory_space<vmem>>, vector<1x8x8xbf16>
    %60 = vector.shape_cast %59 : vector<1x8x8xbf16> to vector<8x8xbf16>
    %61 = vector.shape_cast %57 : vector<8x8xbf16> to vector<1x8x8xbf16>
    tpu.vector_store %arg10[%58, %c0_26, %c0_27], %61 {strides = array<i32>} : memref<1x8x32xbf16, #tpu.memory_space<vmem>>, vector<1x8x8xbf16>,
    %62 = arith.index_cast %c0_i32 : i32 to index
    %c0_28 = arith.constant 0 : index
    %c8 = arith.constant 8 : index
    %63 = vector.load %arg9[%62, %c0_28, %c8] : memref<1x8x96xbf16, #tpu.memory_space<vmem>>, vector<1x8x8xbf16>
    %64 = vector.shape_cast %63 : vector<1x8x8xbf16> to vector<8x8xbf16>
    %65 = arith.index_cast %c0_i32 : i32 to index
    %c0_29 = arith.constant 0 : index
    %c40 = arith.constant 40 : index
    %66 = vector.load %arg9[%65, %c0_29, %c40] : memref<1x8x96xbf16, #tpu.memory_space<vmem>>, vector<1x8x8xbf16>
    %67 = vector.shape_cast %66 : vector<1x8x8xbf16> to vector<8x8xbf16>
    %68 = arith.index_cast %c0_i32 : i32 to index
    %c0_30 = arith.constant 0 : index
    %c72 = arith.constant 72 : index
    %69 = vector.load %arg9[%68, %c0_30, %c72] : memref<1x8x96xbf16, #tpu.memory_space<vmem>>, vector<1x8x8xbf16>
    %70 = vector.shape_cast %69 : vector<1x8x8xbf16> to vector<8x8xbf16>
    %cst_31 = arith.constant dense<0.000000e+00> : vector<8x8xf32>
    %71 = tpu.matmul %64, %67, %cst_31 {dimension_numbers = #tpu.dot_dimension_numbers<[1], [1], [0], [0], [0, 0, 1, 0], [], []>} : vector<8x8xbf16>, vector<8x8xbf16>, vector<8x8xf32> -> vector<8x8xf32>
    %cst_32 = arith.constant dense<0xFF800000> : vector<8xf32>
    %72 = vector.multi_reduction <maximumf>, %71, %cst_32 [1] : vector<8x8xf32> to vector<8xf32>
    %73 = vector.shape_cast %72 : vector<8xf32> to vector<8x1xf32>
    %74 = vector.broadcast %73 : vector<8x1xf32> to vector<8x8xf32>
    %75 = arith.subf %71, %74 : vector<8x8xf32>
    %76 = math.exp %75 : vector<8x8xf32>
    %cst_33 = arith.constant dense<0.000000e+00> : vector<8xf32>
    %77 = vector.multi_reduction <add>, %76, %cst_33 [1] : vector<8x8xf32> to vector<8xf32>
    %78 = vector.shape_cast %77 : vector<8xf32> to vector<8x1xf32>
    %79 = tpu.reciprocal %78 {approx = true} : vector<8x1xf32> -> vector<8x1xf32>
    %80 = vector.broadcast %79 : vector<8x1xf32> to vector<8x8xf32>
    %81 = arith.mulf %76, %80 : vector<8x8xf32>
    %82 = arith.truncf %81 : vector<8x8xf32> to vector<8x8xbf16>
    %cst_34 = arith.constant dense<0.000000e+00> : vector<8x8xf32>
    %83 = tpu.matmul %82, %70, %cst_34 {dimension_numbers = #tpu.dot_dimension_numbers<[1], [0], [0], [1], [0, 0, 1, 1], [], []>} : vector<8x8xbf16>, vector<8x8xbf16>, vector<8x8xf32> -> vector<8x8xf32>
    %84 = arith.truncf %83 : vector<8x8xf32> to vector<8x8xbf16>
    %85 = arith.index_cast %c0_i32 : i32 to index
    %c0_35 = arith.constant 0 : index
    %c8_36 = arith.constant 8 : index
    %86 = vector.load %arg10[%85, %c0_35, %c8_36] : memref<1x8x32xbf16, #tpu.memory_space<vmem>>, vector<1x8x8xbf16>
    %87 = vector.shape_cast %86 : vector<1x8x8xbf16> to vector<8x8xbf16>
    %88 = vector.shape_cast %84 : vector<8x8xbf16> to vector<1x8x8xbf16>
    tpu.vector_store %arg10[%85, %c0_35, %c8_36], %88 {strides = array<i32>} : memref<1x8x32xbf16, #tpu.memory_space<vmem>>, vector<1x8x8xbf16>,
    %89 = arith.index_cast %c0_i32 : i32 to index
    %c0_37 = arith.constant 0 : index
    %c16 = arith.constant 16 : index
    %90 = vector.load %arg9[%89, %c0_37, %c16] : memref<1x8x96xbf16, #tpu.memory_space<vmem>>, vector<1x8x8xbf16>
    %91 = vector.shape_cast %90 : vector<1x8x8xbf16> to vector<8x8xbf16>
    %92 = arith.index_cast %c0_i32 : i32 to index
    %c0_38 = arith.constant 0 : index
    %c48 = arith.constant 48 : index
    %93 = vector.load %arg9[%92, %c0_38, %c48] : memref<1x8x96xbf16, #tpu.memory_space<vmem>>, vector<1x8x8xbf16>
    %94 = vector.shape_cast %93 : vector<1x8x8xbf16> to vector<8x8xbf16>
    %95 = arith.index_cast %c0_i32 : i32 to index
    %c0_39 = arith.constant 0 : index
    %c80 = arith.constant 80 : index
    %96 = vector.load %arg9[%95, %c0_39, %c80] : memref<1x8x96xbf16, #tpu.memory_space<vmem>>, vector<1x8x8xbf16>
    %97 = vector.shape_cast %96 : vector<1x8x8xbf16> to vector<8x8xbf16>
    %cst_40 = arith.constant dense<0.000000e+00> : vector<8x8xf32>
    %98 = tpu.matmul %91, %94, %cst_40 {dimension_numbers = #tpu.dot_dimension_numbers<[1], [1], [0], [0], [0, 0, 1, 0], [], []>} : vector<8x8xbf16>, vector<8x8xbf16>, vector<8x8xf32> -> vector<8x8xf32>
    %cst_41 = arith.constant dense<0xFF800000> : vector<8xf32>
    %99 = vector.multi_reduction <maximumf>, %98, %cst_41 [1] : vector<8x8xf32> to vector<8xf32>
    %100 = vector.shape_cast %99 : vector<8xf32> to vector<8x1xf32>
    %101 = vector.broadcast %100 : vector<8x1xf32> to vector<8x8xf32>
    %102 = arith.subf %98, %101 : vector<8x8xf32>
    %103 = math.exp %102 : vector<8x8xf32>
    %cst_42 = arith.constant dense<0.000000e+00> : vector<8xf32>
    %104 = vector.multi_reduction <add>, %103, %cst_42 [1] : vector<8x8xf32> to vector<8xf32>
    %105 = vector.shape_cast %104 : vector<8xf32> to vector<8x1xf32>
    %106 = tpu.reciprocal %105 {approx = true} : vector<8x1xf32> -> vector<8x1xf32>
    %107 = vector.broadcast %106 : vector<8x1xf32> to vector<8x8xf32>
    %108 = arith.mulf %103, %107 : vector<8x8xf32>
    %109 = arith.truncf %108 : vector<8x8xf32> to vector<8x8xbf16>
    %cst_43 = arith.constant dense<0.000000e+00> : vector<8x8xf32>
    %110 = tpu.matmul %109, %97, %cst_43 {dimension_numbers = #tpu.dot_dimension_numbers<[1], [0], [0], [1], [0, 0, 1, 1], [], []>} : vector<8x8xbf16>, vector<8x8xbf16>, vector<8x8xf32> -> vector<8x8xf32>
    %111 = arith.truncf %110 : vector<8x8xf32> to vector<8x8xbf16>
    %112 = arith.index_cast %c0_i32 : i32 to index
    %c0_44 = arith.constant 0 : index
    %c16_45 = arith.constant 16 : index
    %113 = vector.load %arg10[%112, %c0_44, %c16_45] : memref<1x8x32xbf16, #tpu.memory_space<vmem>>, vector<1x8x8xbf16>
    %114 = vector.shape_cast %113 : vector<1x8x8xbf16> to vector<8x8xbf16>
    %115 = vector.shape_cast %111 : vector<8x8xbf16> to vector<1x8x8xbf16>
    tpu.vector_store %arg10[%112, %c0_44, %c16_45], %115 {strides = array<i32>} : memref<1x8x32xbf16, #tpu.memory_space<vmem>>, vector<1x8x8xbf16>,
    %116 = arith.index_cast %c0_i32 : i32 to index
    %c0_46 = arith.constant 0 : index
    %c24 = arith.constant 24 : index
    %117 = vector.load %arg9[%116, %c0_46, %c24] : memref<1x8x96xbf16, #tpu.memory_space<vmem>>, vector<1x8x8xbf16>
    %118 = vector.shape_cast %117 : vector<1x8x8xbf16> to vector<8x8xbf16>
    %119 = arith.index_cast %c0_i32 : i32 to index
    %c0_47 = arith.constant 0 : index
    %c56 = arith.constant 56 : index
    %120 = vector.load %arg9[%119, %c0_47, %c56] : memref<1x8x96xbf16, #tpu.memory_space<vmem>>, vector<1x8x8xbf16>
    %121 = vector.shape_cast %120 : vector<1x8x8xbf16> to vector<8x8xbf16>
    %122 = arith.index_cast %c0_i32 : i32 to index
    %c0_48 = arith.constant 0 : index
    %c88 = arith.constant 88 : index
    %123 = vector.load %arg9[%122, %c0_48, %c88] : memref<1x8x96xbf16, #tpu.memory_space<vmem>>, vector<1x8x8xbf16>
    %124 = vector.shape_cast %123 : vector<1x8x8xbf16> to vector<8x8xbf16>
    %cst_49 = arith.constant dense<0.000000e+00> : vector<8x8xf32>
    %125 = tpu.matmul %118, %121, %cst_49 {dimension_numbers = #tpu.dot_dimension_numbers<[1], [1], [0], [0], [0, 0, 1, 0], [], []>} : vector<8x8xbf16>, vector<8x8xbf16>, vector<8x8xf32> -> vector<8x8xf32>
    %cst_50 = arith.constant dense<0xFF800000> : vector<8xf32>
    %126 = vector.multi_reduction <maximumf>, %125, %cst_50 [1] : vector<8x8xf32> to vector<8xf32>
    %127 = vector.shape_cast %126 : vector<8xf32> to vector<8x1xf32>
    %128 = vector.broadcast %127 : vector<8x1xf32> to vector<8x8xf32>
    %129 = arith.subf %125, %128 : vector<8x8xf32>
    %130 = math.exp %129 : vector<8x8xf32>
    %cst_51 = arith.constant dense<0.000000e+00> : vector<8xf32>
    %131 = vector.multi_reduction <add>, %130, %cst_51 [1] : vector<8x8xf32> to vector<8xf32>
    %132 = vector.shape_cast %131 : vector<8xf32> to vector<8x1xf32>
    %133 = tpu.reciprocal %132 {approx = true} : vector<8x1xf32> -> vector<8x1xf32>
    %134 = vector.broadcast %133 : vector<8x1xf32> to vector<8x8xf32>
    %135 = arith.mulf %130, %134 : vector<8x8xf32>
    %136 = arith.truncf %135 : vector<8x8xf32> to vector<8x8xbf16>
    %cst_52 = arith.constant dense<0.000000e+00> : vector<8x8xf32>
    %137 = tpu.matmul %136, %124, %cst_52 {dimension_numbers = #tpu.dot_dimension_numbers<[1], [0], [0], [1], [0, 0, 1, 1], [], []>} : vector<8x8xbf16>, vector<8x8xbf16>, vector<8x8xf32> -> vector<8x8xf32>
    %138 = arith.truncf %137 : vector<8x8xf32> to vector<8x8xbf16>
    %139 = arith.index_cast %c0_i32 : i32 to index
    %c0_53 = arith.constant 0 : index
    %c24_54 = arith.constant 24 : index
    %140 = vector.load %arg10[%139, %c0_53, %c24_54] : memref<1x8x32xbf16, #tpu.memory_space<vmem>>, vector<1x8x8xbf16>
    %141 = vector.shape_cast %140 : vector<1x8x8xbf16> to vector<8x8xbf16>
    %142 = vector.shape_cast %138 : vector<8x8xbf16> to vector<1x8x8xbf16>
    tpu.vector_store %arg10[%139, %c0_53, %c24_54], %142 {strides = array<i32>} : memref<1x8x32xbf16, #tpu.memory_space<vmem>>, vector<1x8x8xbf16>,
    %c1_i32 = arith.constant 1 : i32
    %c0_55 = arith.constant 0 : index
    %c0_56 = arith.constant 0 : index
    %c0_57 = arith.constant 0 : index
    %143 = vector.load %arg10[%c0_55, %c0_56, %c0_57] : memref<1x8x32xbf16, #tpu.memory_space<vmem>>, vector<1x8x32xbf16>
    %144 = vector.shape_cast %143 : vector<1x8x32xbf16> to vector<8x32xbf16>
    %c0_58 = arith.constant 0 : index
    %c0_59 = arith.constant 0 : index
    %145 = vector.load %arg6[%c0_58, %c0_59] : memref<32x32xbf16, #tpu.memory_space<vmem>>, vector<32x32xbf16>
    %cst_60 = arith.constant dense<0.000000e+00> : vector<8x32xf32>
    %146 = tpu.matmul %144, %145, %cst_60 {dimension_numbers = #tpu.dot_dimension_numbers<[1], [0], [0], [1], [0, 0, 1, 1], [], []>} : vector<8x32xbf16>, vector<32x32xbf16>, vector<8x32xf32> -> vector<8x32xf32>
    %c0_61 = arith.constant 0 : index
    %c0_62 = arith.constant 0 : index
    %147 = vector.load %arg7[%c0_61, %c0_62] : memref<1x32xf32, #tpu.memory_space<vmem>>, vector<1x32xf32>
    %148 = vector.broadcast %147 : vector<1x32xf32> to vector<8x32xf32>
    %149 = arith.addf %146, %148 : vector<8x32xf32>
    %c0_63 = arith.constant 0 : index
    %c0_64 = arith.constant 0 : index
    %c0_65 = arith.constant 0 : index
    %150 = vector.load %arg1[%c0_63, %c0_64, %c0_65] : memref<1x8x32xf32, #tpu.memory_space<vmem>>, vector<1x8x32xf32>
    %151 = vector.shape_cast %149 : vector<8x32xf32> to vector<1x8x32xf32>
    %152 = arith.addf %150, %151 : vector<1x8x32xf32>
    %c0_66 = arith.constant 0 : index
    %c0_67 = arith.constant 0 : index
    %c0_68 = arith.constant 0 : index
    %153 = vector.load %arg8[%c0_66, %c0_67, %c0_68] : memref<1x8x32xf32, #tpu.memory_space<vmem>>, vector<1x8x32xf32>
    tpu.vector_store %arg8[%c0_66, %c0_67, %c0_68], %152 {strides = array<i32>} : memref<1x8x32xf32, #tpu.memory_space<vmem>>, vector<1x8x32xf32>,
    return
  }
  func.func @transform_0(%arg0: i32) -> (i32, i32, i32) {
    %c0_i32 = arith.constant 0 : i32
    %c0_i32_0 = arith.constant 0 : i32
    %c0_i32_1 = arith.constant 0 : i32
    return %arg0, %c0_i32, %c0_i32_0 : i32, i32, i32
  }
  func.func @transform_1(%arg0: i32) -> (i32, i32) {
    %c0_i32 = arith.constant 0 : i32
    %c0_i32_0 = arith.constant 0 : i32
    %c0_i32_1 = arith.constant 0 : i32
    return %c0_i32, %c0_i32_0 : i32, i32
  }
  func.func @transform_2(%arg0: i32) -> (i32, i32) {
    %c0_i32 = arith.constant 0 : i32
    %c0_i32_0 = arith.constant 0 : i32
    %c0_i32_1 = arith.constant 0 : i32
    return %c0_i32, %c0_i32_0 : i32, i32
  }
  func.func @transform_3(%arg0: i32) -> (i32, i32) {
    %c0_i32 = arith.constant 0 : i32
    %c0_i32_0 = arith.constant 0 : i32
    %c0_i32_1 = arith.constant 0 : i32
    return %c0_i32, %c0_i32_0 : i32, i32
  }
  func.func @transform_4(%arg0: i32) -> (i32, i32) {
    %c0_i32 = arith.constant 0 : i32
    %c0_i32_0 = arith.constant 0 : i32
    %c0_i32_1 = arith.constant 0 : i32
    return %c0_i32, %c0_i32_0 : i32, i32
  }
  func.func @transform_5(%arg0: i32) -> (i32, i32) {
    %c0_i32 = arith.constant 0 : i32
    %c0_i32_0 = arith.constant 0 : i32
    %c0_i32_1 = arith.constant 0 : i32
    return %c0_i32, %c0_i32_0 : i32, i32
  }
  func.func @transform_6(%arg0: i32) -> (i32, i32) {
    %c0_i32 = arith.constant 0 : i32
    %c0_i32_0 = arith.constant 0 : i32
    %c0_i32_1 = arith.constant 0 : i32
    return %c0_i32, %c0_i32_0 : i32, i32
  }
  func.func @transform_7(%arg0: i32) -> (i32, i32, i32) {
    %c0_i32 = arith.constant 0 : i32
    %c0_i32_0 = arith.constant 0 : i32
    %c0_i32_1 = arith.constant 0 : i32
    return %arg0, %c0_i32, %c0_i32_0 : i32, i32, i32
  }
}

</mosaic_0001>

<bundles_post_ra>
// kernel: tpu_custom_call.1
= control target key start
LH: loop header
LB: loop body
LE: loop exit
PB: predicated region body
PF: predicated region fallthrough
CT: control target
= control target key end

     0   :  { %12 = vsyncpa [#allocation5], 0  ;;  %s2216_s0 = inlined_call_operand.hbm [shape: f32[2,8,32], index: 0, kind: input, shape index: {}]   ;;  %s2217_s1 = inlined_call_operand.hbm [shape: f32[1,32], index: 1, kind: input, shape index: {}]   ;;  %s2218_s2 = inlined_call_operand.hbm [shape: f32[1,32], index: 2, kind: input, shape index: {}]   ;;  %s2219_s3 = inlined_call_operand.hbm [shape: bf16[32,96], index: 3, kind: input, shape index: {}]   ;;  %s2220_s4 = inlined_call_operand.hbm [shape: f32[1,96], index: 4, kind: input, shape index: {}]   ;;  %s2221_s5 = inlined_call_operand.hbm [shape: bf16[32,32], index: 5, kind: input, shape index: {}]   ;;  %s2222_s6 = inlined_call_operand.hbm [shape: f32[1,32], index: 6, kind: input, shape index: {}]   ;;  %s2223_s7 = inlined_call_operand.hbm [shape: f32[2,8,32], index: 7, kind: output, shape index: {}]  }
   0x1   :  { %14 = vsyncpa [#allocation5 + $0x1], 0 }
   0x2   :  { %15 = vsyncpa [#allocation8], 0 }
   0x3   :  { %16 = vsyncpa [#allocation11], 0 }
   0x4   :  { %17 = vsyncpa [#allocation14], 0 }
   0x5   :  { %18 = vsyncpa [#allocation6], 0 }
   0x6   :  { %20 = vsyncpa [#allocation6 + $0x1], 0  ;;  %s1806_s24 = smov 0   ;;  %s1808_s25 = smov 0  }
   0x7   :  { %s1810_s26 = smov 0   ;;  %s1812_s27 = smov 0  }
   0x8 LB: > { %s1740_s28 = smov [#allocation7]   ;;  %s1827_s30 = sadd.s32 4294967295, %s1738_s27   ;;  %s1738_s27 = sphi %s1812_s27, %s2249_s27   ;;  %s1734_s26 = sphi %s1810_s26, %s2248_s26   ;;  %s1730_s25 = sphi %s1808_s25, %s2247_s25   ;;  %s1726_s24 = sphi %s1806_s24, %s2246_s24  }
   0x9   : > { %s222_s29 = sshll.u32 %s1740_s28, 4  ;;  %p1174_p0 = scmp.ge.s32.totalorder %s1738_s27, 1  ;;  %s1832_s29 = int_to_ptr.vmem [resolvable:$true] %s222_s29 }
   0xa   : > { %p2224_p1 = scmp.eq.s32.totalorder %s1827_s30, 0  ;;  %p209_p2 = scmp.lt.s32.totalorder %s1738_s27, 3 }
   0xb   : > { %s1741_s9 = smov [#allocation10]   ;;  %s1742_s12 = smov [#allocation13]  }
   0xc   : > { %p1834_p3 = pnand %p1174_p0, %p209_p2  ;;  %s243_s10 = sshll.u32 %s1741_s9, 4  ;;  %s1841_s10 = int_to_ptr.vmem [resolvable:$true] %s243_s10 }
   0xd   : > { %s267_s13 = sshll.u32 %s1742_s12, 4  ;;  %s1462_s16 = scalar_lea.hbm %s2217_s1, 16  ;;  %s1849_s13 = int_to_ptr.vmem [resolvable:$true] %s267_s13 }
   0xe   : > { %s2227_s8 = scalar_select %p1834_p3, 1, 0 }
   0xf   : > { %p1339_p5 = pneg %p1834_p3  ;;  %p1463_p7 = scmp.ne.s32.totalorder %s2217_s1, %s1462_s16 }
  0x10   : > { %p1469_p11 = scmp.lt.u32.totalorder %s1462_s16, %s2217_s1 }
  0x11   : > { %p1845_p6 = pnand %p1339_p5, %p2224_p1 }
  0x13   : > { %p1859_p8 = pneg %p1845_p6 }
  0x15   : > { %p1465_p9 = pnand %p1859_p8, %p1463_p7 }
  0x17   : > { %p1466_p10 = pneg %p1465_p9 }
  0x19   : > { %p1471_p12 = pnand %p1469_p11, %p1466_p10 }
  0x1b   : > { %1474 = shalt.err (!%p1471_p12)
}
  0x1c   : > { %s1475_s22 = scalar_lea.vmem %s1832_s29, 16  ;;  %s1482_s23 = scalar_lea.vmem %s1832_s29, 32 }
  0x1d   : > { %p1476_p13 = scmp.ne.s32.totalorder %s1832_s29, %s1475_s22  ;;  %p1483_p5 = scmp.lt.s32.totalorder %s1832_s29, %s1832_s29 }
  0x1e   : > { %p1484_p7 = scmp.lt.s32.totalorder %s1482_s23, %s1475_s22 }
  0x1f   : > { %p1478_p0 = pnand %p1476_p13, %p1859_p8 }
  0x20   : > { %p1485_p9 = por %p1484_p7, %p1483_p5 }
  0x21   : > { %p1479_p2 = pneg %p1478_p0 }
  0x23   : > { %p1486_p4 = pnand %p1485_p9, %p1479_p2 }
  0x25   : > { %1489 = shalt.err (!%p1486_p4)
}
  0x26   : > { %1342 = dma.hbm_to_vmem [thread:$0]  (!%p1845_p6), %s2217_s1, 16, %s1832_s29, [#allocation8]  }
  0x27   : > { %s1490_s15 = scalar_lea.hbm %s2219_s3, 256 }
  0x28   : > { %p1491_p10 = scmp.ne.s32.totalorder %s2219_s3, %s1490_s15  ;;  %p1497_p4 = scmp.lt.u32.totalorder %s1490_s15, %s2219_s3 }
  0x2a   : > { %p1493_p11 = pnand %p1491_p10, %p1859_p8 }
  0x2c   : > { %p1494_p12 = pneg %p1493_p11 }
  0x2e   : > { %p1499_p13 = pnand %p1497_p4, %p1494_p12 }
  0x30   : > { %1502 = shalt.err (!%p1499_p13)
}
  0x31   : > { %s1503_s29 = scalar_lea.vmem %s1841_s10, 256  ;;  %p1511_p7 = scmp.lt.s32.totalorder %s1841_s10, %s1841_s10 }
  0x32   : > { %p1504_p0 = scmp.ne.s32.totalorder %s1841_s10, %s1503_s29  ;;  %p1512_p9 = scmp.lt.s32.totalorder %s1503_s29, %s1503_s29 }
  0x34   : > { %p1506_p2 = pnand %p1504_p0, %p1859_p8  ;;  %p1513_p10 = por %p1512_p9, %p1511_p7 }
  0x36   : > { %p1507_p5 = pneg %p1506_p2 }
  0x38   : > { %p1514_p11 = pnand %p1513_p10, %p1507_p5 }
  0x3a   : > { %1517 = shalt.err (!%p1514_p11)
}
  0x3b   : > { %s1743_s21 = smov 64   ;;  %s1744_s22 = smov 4  }
  0x3c   : > { %1348 = dma.hbm_to_vmem [thread:$0]  (!%p1845_p6), %s2219_s3, 256, %s1841_s10, [#allocation11], %s1743_s21, %s1743_s21, %s1744_s22  }
  0x3d   : > { %s1518_s14 = scalar_lea.hbm %s2221_s5, 256 }
  0x3e   : > { %p1519_p12 = scmp.ne.s32.totalorder %s2221_s5, %s1518_s14  ;;  %p1525_p0 = scmp.lt.u32.totalorder %s1518_s14, %s2221_s5 }
  0x40   : > { %p1521_p4 = pnand %p1519_p12, %p1859_p8 }
  0x42   : > { %p1522_p13 = pneg %p1521_p4 }
  0x44   : > { %p1527_p2 = pnand %p1525_p0, %p1522_p13 }
  0x46   : > { %1530 = shalt.err (!%p1527_p2)
}
  0x47   : > { %s1531_s10 = scalar_lea.vmem %s1849_s13, 256  ;;  %p1539_p10 = scmp.lt.s32.totalorder %s1849_s13, %s1849_s13 }
  0x48   : > { %p1532_p5 = scmp.ne.s32.totalorder %s1849_s13, %s1531_s10  ;;  %p1540_p11 = scmp.lt.s32.totalorder %s1531_s10, %s1531_s10 }
  0x4a   : > { %p1534_p7 = pnand %p1532_p5, %p1859_p8  ;;  %p1541_p12 = por %p1540_p11, %p1539_p10 }
  0x4c   : > { %p1535_p9 = pneg %p1534_p7 }
  0x4e   : > { %p1542_p4 = pnand %p1541_p12, %p1535_p9 }
  0x50   : > { %1545 = shalt.err (!%p1542_p4)
}
  0x51   : > { %1354 = dma.hbm_to_vmem [thread:$0]  (!%p1845_p6), %s2221_s5, 256, %s1849_s13, [#allocation14], %s1743_s21, %s1743_s21, %s1744_s22  }
  0x52   : > { %s1745_s23 = smov [#allocation9]   ;;  %s1746_s9 = smov [#allocation12]  }
  0x53   : > { %s233_s28 = sshll.u32 %s1745_s23, 4  ;;  %s257_s12 = sshll.u32 %s1746_s9, 4  ;;  %s234_s28 = int_to_ptr.vmem [resolvable:$true] %s233_s28  ;;  %s258_s12 = int_to_ptr.vmem [resolvable:$true] %s257_s12 }
  0x54   : > { %s1546_s16 = scalar_lea.hbm %s2218_s2, 16 }
  0x55   : > { %p1547_p13 = scmp.ne.s32.totalorder %s2218_s2, %s1546_s16  ;;  %p1553_p5 = scmp.lt.u32.totalorder %s1546_s16, %s2218_s2 }
  0x57   : > { %p1549_p0 = pnand %p1547_p13, %p1859_p8 }
  0x59   : > { %p1550_p2 = pneg %p1549_p0 }
  0x5b   : > { %p1555_p7 = pnand %p1553_p5, %p1550_p2 }
  0x5d   : > { %1558 = shalt.err (!%p1555_p7)
}
  0x5e   : > { %s1559_s13 = scalar_lea.vmem %s234_s28, 16  ;;  %s1566_s21 = scalar_lea.vmem %s234_s28, 32 }
  0x5f   : > { %p1560_p9 = scmp.ne.s32.totalorder %s234_s28, %s1559_s13  ;;  %p1567_p12 = scmp.lt.s32.totalorder %s234_s28, %s234_s28 }
  0x60   : > { %p1568_p4 = scmp.lt.s32.totalorder %s1566_s21, %s1559_s13 }
  0x61   : > { %p1562_p10 = pnand %p1560_p9, %p1859_p8 }
  0x62   : > { %p1569_p1 = por %p1568_p4, %p1567_p12 }
  0x63   : > { %p1563_p11 = pneg %p1562_p10 }
  0x65   : > { %p1570_p3 = pnand %p1569_p1, %p1563_p11 }
  0x67   : > { %1573 = shalt.err (!%p1570_p3)
}
  0x68   : > { %1345 = dma.hbm_to_vmem [thread:$0]  (!%p1845_p6), %s2218_s2, 16, %s234_s28, [#allocation8]  }
  0x69   : > { %s1574_s14 = scalar_lea.hbm %s2220_s4, 16 }
  0x6a   : > { %p1575_p13 = scmp.ne.s32.totalorder %s2220_s4, %s1574_s14  ;;  %p1581_p3 = scmp.lt.u32.totalorder %s1574_s14, %s2220_s4 }
  0x6c   : > { %p1577_p0 = pnand %p1575_p13, %p1859_p8 }
  0x6e   : > { %p1578_p1 = pneg %p1577_p0 }
  0x70   : > { %p1583_p2 = pnand %p1581_p3, %p1578_p1 }
  0x72   : > { %1586 = shalt.err (!%p1583_p2)
}
  0x73   : > { %s1587_s10 = scalar_lea.vmem %s258_s12, 16  ;;  %s1594_s28 = scalar_lea.vmem %s258_s12, 32 }
  0x74   : > { %p1588_p5 = scmp.ne.s32.totalorder %s258_s12, %s1587_s10  ;;  %p1595_p10 = scmp.lt.s32.totalorder %s258_s12, %s258_s12 }
  0x75   : > { %p1596_p11 = scmp.lt.s32.totalorder %s1594_s28, %s1587_s10 }
  0x76   : > { %p1590_p7 = pnand %p1588_p5, %p1859_p8 }
  0x77   : > { %p1597_p12 = por %p1596_p11, %p1595_p10 }
  0x78   : > { %p1591_p9 = pneg %p1590_p7 }
  0x7a   : > { %p1598_p4 = pnand %p1597_p12, %p1591_p9 }
  0x7c   : > { %1601 = shalt.err (!%p1598_p4)
}
  0x7d   : > { %1351 = dma.hbm_to_vmem [thread:$0]  (!%p1845_p6), %s2220_s4, 16, %s258_s12, [#allocation11]  }
  0x7e   : > { %s1747_s21 = smov [#allocation15]   ;;  %s1602_s9 = scalar_lea.hbm %s2222_s6, 16 }
  0x7f   : > { %s281_s22 = sshll.u32 %s1747_s21, 4  ;;  %p1603_p13 = scmp.ne.s32.totalorder %s2222_s6, %s1602_s9  ;;  %s282_s22 = int_to_ptr.vmem [resolvable:$true] %s281_s22 }
  0x80   : > { %p1609_p3 = scmp.lt.u32.totalorder %s1602_s9, %s2222_s6 }
  0x81   : > { %p1605_p0 = pnand %p1603_p13, %p1859_p8 }
  0x83   : > { %p1606_p1 = pneg %p1605_p0 }
  0x85   : > { %p1611_p2 = pnand %p1609_p3, %p1606_p1 }
  0x87   : > { %1614 = shalt.err (!%p1611_p2)
}
  0x88   : > { %s1615_s12 = scalar_lea.vmem %s282_s22, 16  ;;  %s1622_s18 = scalar_lea.vmem %s282_s22, 32 }
  0x89   : > { %p1616_p5 = scmp.ne.s32.totalorder %s282_s22, %s1615_s12  ;;  %p1623_p10 = scmp.lt.s32.totalorder %s282_s22, %s282_s22 }
  0x8a   : > { %p1624_p11 = scmp.lt.s32.totalorder %s1622_s18, %s1615_s12 }
  0x8b   : > { %p1618_p7 = pnand %p1616_p5, %p1859_p8 }
  0x8c   : > { %p1625_p12 = por %p1624_p11, %p1623_p10 }
  0x8d   : > { %p1619_p9 = pneg %p1618_p7 }
  0x8f   : > { %p1626_p4 = pnand %p1625_p12, %p1619_p9 }
  0x91   : > { %1629 = shalt.err (!%p1626_p4)
}
  0x92   : > { %1357 = dma.hbm_to_vmem [thread:$0]  (!%p1845_p6), %s2222_s6, 16, %s282_s22, [#allocation14]  }
  0x93   : > { %s1173_s19 = sadd.s32 4294967294, %s1738_s27   ;;  %s1983_s11 = sadd.s32 1, %s1738_s27  }
  0x94   : > { %s30_s20 = ssub.s32 %s1738_s27, %s1983_s11  ;;  %s33_s13 = sadd.s32 1, %s1734_s26 }
  0x95   : > { %p31_p8 = scmp.eq.s32.totalorder %s30_s20, 0  ;;  %p40_p13 = scmp.ne.s32.totalorder %s1734_s26, %s1730_s25 }
  0x96   : > { %p41_p0 = scmp.eq.s32.totalorder %s1738_s27, 0  ;;  %p46_p1 = scmp.ne.s32.totalorder %s1730_s25, %s1726_s24 }
  0x97   : > { %s1994_s21 = scalar_select %p31_p8, %s1734_s26, %s33_s13  }
  0x98   : > { %p1996_p3 = por %p41_p0, %p40_p13  ;;  %p2231_p2 = scmp.eq.s32.totalorder %s1827_s30, 0 }
  0x99   : > { %p196_p5 = scmp.eq.s32.totalorder %s1827_s30, 1  ;;  %p202_p7 = scmp.eq.s32.totalorder %s1173_s19, 1 }
  0x9a   : > { %p2002_p6 = por %p2231_p2, %p46_p1  ;;  %p1372_p9 = scmp.lt.s32.totalorder %s1738_s27, 2 }
  0x9b   : > { %s292_s23 = sand.u32 1, %s1734_s26   ;;  %p2009_p10 = por %p196_p5, %p40_p13 }
  0x9c   : > { %p2013_p11 = por %p202_p7, %p46_p1  ;;  %s1182_s15 = sshll.u32 %s292_s23, 3 }
  0x9d   : > { %s2233_s9 = scalar_select %p2009_p10, 1, 0 }
  0x9e   : > { %s2234_s14 = scalar_select %p2013_p11, 1, 0 }
  0x9f   : > { %s1183_s16 = sshll.u32 %s1738_s27, 7  ;;  %s296_s10 = scalar_lea.vmem [#allocation4], %s1182_s15 }
  0xa0   : > { %s2021_s18 = scalar_lea.hbm %s2216_s0, %s1183_s16  ;;  %s303_s28 = sshll.u32 %s296_s10, 4  ;;  %s2023_s28 = int_to_ptr.vmem [resolvable:$true] %s303_s28 }
  0xa1   : > { %p2027_p12 = pnand %p1372_p9, %p1996_p3  ;;  %s293_s20 = scalar_lea.sflag [#allocation5], %s292_s23 }
  0xa2   : > { %s1630_s13 = scalar_lea.hbm %s2021_s18, 128  ;;  %s1635_s17 = scalar_lea.hbm %s2216_s0, 256 }
  0xa3   : > { %p1631_p4 = scmp.ne.s32.totalorder %s2021_s18, %s1630_s13  ;;  %p1632_p8 = pneg %p2027_p12 }
  0xa4   : > { %p1636_p1 = scmp.lt.u32.totalorder %s2021_s18, %s2216_s0  ;;  %p1637_p3 = scmp.lt.u32.totalorder %s1635_s17, %s1630_s13 }
  0xa5   : > { %p1633_p13 = pnand %p1632_p8, %p1631_p4  ;;  %p1639_p5 = scmp.lt.u32.totalorder %s1630_s13, %s2021_s18 }
  0xa6   : > { %p1638_p2 = por %p1637_p3, %p1636_p1 }
  0xa7   : > { %p1634_p0 = pneg %p1633_p13 }
  0xa8   : > { %p1640_p7 = por %p1639_p5, %p1638_p2 }
  0xaa   : > { %p1641_p9 = pnand %p1640_p7, %p1634_p0 }
  0xac   : > { %1644 = shalt.err (!%p1641_p9)
}
  0xad   : > { %s1645_s23 = scalar_lea.vmem %s2023_s28, 128  ;;  %s1748_s10 = smov [#allocation4]  }
  0xae   : > { %p1646_p4 = scmp.ne.s32.totalorder %s2023_s28, %s1645_s23  ;;  %s1650_s15 = sshll.u32 %s1748_s10, 4  ;;  %s1651_s15 = int_to_ptr.vmem [resolvable:$false] %s1650_s15 }
  0xaf   : > { %s1652_s16 = scalar_lea.vmem %s1651_s15, 256  ;;  %p1653_p10 = scmp.lt.s32.totalorder %s2023_s28, %s1651_s15 }
  0xb0   : > { %p1648_p13 = pnand %p1646_p4, %p1632_p8  ;;  %p1654_p1 = scmp.lt.s32.totalorder %s1652_s16, %s1645_s23 }
  0xb2   : > { %p1649_p11 = pneg %p1648_p13  ;;  %p1655_p3 = por %p1654_p1, %p1653_p10 }
  0xb4   : > { %p1656_p2 = pnand %p1655_p3, %p1649_p11 }
  0xb6   : > { %1659 = shalt.err (!%p1656_p2)
}
  0xb7   : > { %1361 = dma.hbm_to_vmem [thread:$0]  (!%p2027_p12), %s2021_s18, 128, %s2023_s28, %s293_s20  }
  0xb8   : > { %p2236_p0 = scmp.ne.s32.totalorder %s2227_s8, 0 }
  0xb9   : > { %s2059_s13 = sand.u32 (!%p2236_p0), 1, %s1730_s25  }
  0xba   : > { %312 = sbr.rel (%p2236_p0) target bundleno = 2026 (0x7ea), region = 48  ;;  %s1185_s17 = sshll.u32 (!%p2236_p0), %s2059_s13, 3 }
  0xbb   : > { %s315_s29 = scalar_lea.sflag (!%p2236_p0), [#allocation5], %s2059_s13  ;;  %s318_s12 = scalar_lea.vmem (!%p2236_p0), [#allocation4], %s1185_s17 }
  0xc1   : > { %1705 = dma.done.wait (%p2002_p6), %s315_s29, 128  }
  0xc2   : > { %1707 = vsyncadd (%p2002_p6), %s315_s29, 4294967168  ;;  %p2237_p10 = scmp.eq.s32.totalorder %s1827_s30, 0 }
  0xc4   : > { %1709 = dma.done.wait (%p2237_p10), [#allocation8], 32   ;;  %p2238_p11 = pmov %p2237_p10 }
  0xc5   : > { %p2239_p12 = pmov %p2237_p10 }
  0xc6   : > { %1711 = vsyncadd (%p2238_p11), [#allocation8], 4294967264 }
  0xc7   : > { %1713 = dma.done.wait (%p2239_p12), [#allocation11], 272   ;;  %p2240_p8 = pmov %p2237_p10 }
  0xc9   : > { %1715 = vsyncadd (%p2240_p8), [#allocation11], 4294967024  ;;  %p2241_p5 = pmov %p2240_p8 }
  0xcb   : > { %1717 = dma.done.wait (%p2241_p5), [#allocation14], 272   ;;  %p2242_p7 = pmov %p2241_p5 }
  0xcc   : > { %vm377_vm0 = vcmask 261120   ;;  %v2081_v0 = vld [vmem:[%s318_s12] sm:$0xff]  ;;  %v1436_v7 = vld [vmem:[#allocation10] sm:$0xff]   ;;  %v1749_v8 = vmov 0.0   ;;  %vm1750_vm1 = vmmov 0   ;;  %vm474_vm2 = vcmask 781312  }
  0xcd   : > { %1719 = vsyncadd (%p2242_p7), [#allocation14], 4294967024  ;;  %v378_v1 = vsel %vm377_vm0, %v2081_v0, 0.0  ;;  %1247 = vmatprep.subr.bf16.mxu0 %v1749_v8  ;;  %1251 = vmatprep.mubr.msk.bf16.mxu0 %vm1750_vm1, %v1749_v8  ;;  %v1437_v9 = vld [vmem:[#allocation10 + $0x8] sm:$0xff]   ;;  %v1193_v14 = vld [vmem:[#allocation7] ss:$0 sm:$0xff] }
  0xce   : > { %379 = vadd.xlane.f32.xlu0 %v378_v1  ;;  %1248 = vmatpush3.bf16.msra.mxu0 %v1436_v7  ;;  %v1194_v16 = vld [vmem:[#allocation9] ss:$0 sm:$0xff]  ;;  %v1195_v20 = vld [vmem:[#allocation12] ss:$0 sm:$0xff]  ;;  %s1751_s8 = smov 120   ;;  %s1752_s22 = smov 96  }
  0xcf   : > { %1255 = vmatprep.subr.bf16.mxu1 %v1749_v8  ;;  %1249 = vmatprep.subr.bf16.mxu0 %v1749_v8  ;;  %s1753_s18 = smov 88   ;;  %s1754_s28 = smov 80   ;;  %vm482_vm3 = vcmask 64512   ;;  %vm546_vm4 = vcmask 1043456   ;;  %vm591_vm5 = vcmask 60416   ;;  %vm714_vm6 = vcmask 126016  }
  0xd0   : > { %1257 = vmatprep.mubr.msk.bf16.mxu1 %vm1750_vm1, %v1749_v8  ;;  %s1755_s19 = smov 112   ;;  %s1756_s20 = smov 72   ;;  %vm837_vm7 = vcmask 191616   ;;  %vm960_vm8 = vcmask 257216  }
  0xd1   : > { %s1757_s23 = smov 104   ;;  %s1758_s10 = smov 64  }
  0xd2   : > { %1250 = vmatpush3.bf16.msra.mxu0 %v1437_v9  ;;  %s1759_s15 = smov 56   ;;  %s1760_s16 = smov 48  }
  0xd3   : > { %1261 = vmatprep.subr.bf16.mxu0 %v1749_v8  ;;  %s1761_s29 = smov 40   ;;  %s1762_s12 = smov 8  }
  0xd4   : > { %p2243_p9 = scmp.ne.s32.totalorder %s2233_s9, 0 }
 0x15b   : > { %v380_v2 = vpop.xlane.xlu0 %379 }
 0x15c   : > { %v382_v3 = vmul.f32 0.03125, %v380_v2 }
 0x15e   : > { %v383_v4 = vsub.f32 %v2081_v0, %v382_v3 }
 0x160   : > { %v384_v5 = vmul.f32 %v383_v4, %v383_v4 }
 0x162   : > { %v385_v6 = vsel %vm377_vm0, %v384_v5, 0.0 }
 0x163   : > { %386 = vadd.xlane.f32.xlu0 %v385_v6 }
 0x1f0   : > { %v387_v10 = vpop.xlane.xlu0 %386 }
 0x1f1   : > { %v388_v11 = vmul.f32 0.03125, %v387_v10 }
 0x1f3   : > { %v389_v12 = vadd.f32 1e-05, %v388_v11 }
 0x1f5   : > { %1444 = vrsqrt.f32 %v389_v12 }
 0x1ff   : > { %v1445_v13 = vpop.eup %1444 }
 0x200   : > { %v391_v15 = vmul.f32 %v1445_v13, %v383_v4 }
 0x202   : > { %v398_v17 = vmul.f32 %v1193_v14, %v391_v15 }
 0x204   : > { %v405_v18 = vadd.f32 %v1194_v16, %v398_v17 }
 0x206   : > { %v406_v19 = vpack.c.bf16 %v405_v18, %v405_v18 }
 0x208   : > { %1252 = vmatmul.mubr.msk.bf16.vlgmr.msra.gmra.mrb[0].mxu0 %vm377_vm0, %v406_v19 }
 0x209   : > { %1263 = vmatprep.mubr.msk.bf16.mxu0 %vm1750_vm1, %v1749_v8 }
 0x2db   : > { %v467_v21 = vpop.f32.mrb[0].mxu0 }
 0x2dc   : > { %v468_v22 = vadd.f32 %v1195_v20, %v467_v21  ;;  %v1253_v23 = vpop.f32.mrb[1].mxu0 }
 0x2dd   : > { %v470_v24 = vpop.f32.mrb[2].mxu0 }
 0x2de   : > { %v473_v25 = vpack.c.bf16 %v468_v22, %v468_v22  ;;  %v1254_v26 = vpop.f32.mrb[3].mxu0 }
 0x2e0   : > { %475 = vst.msk [vmem:[#allocation2] sm:$0xf] %vm474_vm2, %v473_v25 }
 0x2e7   : > { %v2098_v27 = vld [vmem:[#allocation2] ss:$0 sps:$4 sm:$0xff]  }
 0x2e8   : > { %v476_v28 = vld [vmem:[#allocation2] sm:$0xf]  ;;  %597 = vrot.lane.b32.xlu0 %v2098_v27, %s1751_s8  ;;  %s1763_s8 = smov 16  }
 0x2e9   : > { %v2100_v29 = vcombine.low %v476_v28, %v476_v28  ;;  %v2105_v30 = vld [vmem:[#allocation2] ss:$0 sps:$4 sm:$0xff]  }
 0x2ea   : > { %v2109_v31 = vld [vmem:[#allocation2] ss:$0 sps:$4 sm:$0xff]  }
 0x2eb   : > { %480 = vrot.lane.b32.xlu1 %v2100_v29, %s1752_s22  ;;  %s1764_s22 = smov 24  }
 0x2ef   : > { %599 = vrot.lane.b32.xlu1 %v2098_v27, %s1753_s18  ;;  %s1219_s18 = sshll.u32 %s1827_s30, 7  ;;  %s1033_s30 = scalar_lea.sflag [#allocation6], %s2059_s13 }
 0x2f3   : > { %722 = vrot.lane.b32.xlu1 %v2105_v30, %s1754_s28  ;;  %s372_s28 = scalar_lea.vmem [#allocation16], %s1185_s17 }
 0x2f7   : > { %720 = vrot.lane.b32.xlu1 %v2105_v30, %s1755_s19  ;;  %s1046_s19 = sshll.u32 %s372_s28, 4  ;;  %s2173_s19 = int_to_ptr.vmem [resolvable:$true] %s1046_s19 }
 0x2f8   : > { %s1660_s17 = scalar_lea.vmem %s2173_s19, 128 }
 0x2f9   : > { %p1661_p6 = scmp.ne.s32.totalorder %s2173_s19, %s1660_s17 }
 0x2fb   : > { %845 = vrot.lane.b32.xlu1 %v2109_v31, %s1756_s20  ;;  %p1662_p4 = pnand %p1661_p6, %p2243_p9 }
 0x2fd   : > { %p1663_p13 = pneg %p1662_p4 }
 0x2ff   : > { %843 = vrot.lane.b32.xlu1 %v2109_v31, %s1757_s23 }
 0x35a   : > { %v598_v37 = vpop.permute.xlu0 %597 }
 0x35d   : > { %v481_v32 = vpop.permute.xlu1 %480 }
 0x35e   : > { %v487_v33 = vsel %vm482_vm3, %v481_v32, 0 }
 0x35f   : > { %1256 = vmatpush3.bf16.xpose.msra.mxu1 %v487_v33 }
 0x360   : > { %1267 = vmatprep.subr.bf16.mxu1 %v1749_v8 }
 0x361   : > { %v600_v34 = vpop.permute.xlu1 %599 }
 0x362   : > { %v605_v35 = vsel %vm482_vm3, %v600_v34, 0 }
 0x365   : > { %v723_v36 = vpop.permute.xlu1 %722 }
 0x366   : > { %1258 = vmatmul.mubr.msk.bf16.vlgmr.msra.gmra.mrb[0].mxu1 %vm482_vm3, %v476_v28  ;;  %v728_v39 = vsel %vm482_vm3, %v723_v36, 0 }
 0x367   : > { %1268 = vmatpush3.bf16.xpose.msra.mxu1 %v605_v35  ;;  %1269 = vmatprep.mubr.msk.bf16.mxu1 %vm1750_vm1, %v1749_v8 }
 0x368   : > { %1279 = vmatprep.subr.bf16.mxu1 %v1749_v8 }
 0x369   : > { %v721_v38 = vpop.permute.xlu1 %720 }
 0x36d   : > { %v846_v40 = vpop.permute.xlu1 %845 }
 0x36e   : > { %1270 = vmatmul.mubr.msk.bf16.vlgmr.msra.gmra.mrb[4].mxu1 %vm482_vm3, %v598_v37  ;;  %v851_v41 = vsel %vm482_vm3, %v846_v40, 0 }
 0x36f   : > { %1280 = vmatpush3.bf16.xpose.msra.mxu1 %v728_v39  ;;  %1281 = vmatprep.mubr.msk.bf16.mxu1 %vm1750_vm1, %v1749_v8 }
 0x370   : > { %1291 = vmatprep.subr.bf16.mxu1 %v1749_v8 }
 0x371   : > { %v844_v42 = vpop.permute.xlu1 %843 }
 0x376   : > { %1282 = vmatmul.mubr.msk.bf16.vlgmr.msra.gmra.mrb[8].mxu1 %vm482_vm3, %v721_v38 }
 0x377   : > { %1292 = vmatpush3.bf16.xpose.msra.mxu1 %v851_v41  ;;  %1293 = vmatprep.mubr.msk.bf16.mxu1 %vm1750_vm1, %v1749_v8 }
 0x378   : > { %1303 = vmatprep.subr.bf16.mxu1 %v1749_v8 }
 0x37e   : > { %1294 = vmatmul.mubr.msk.bf16.vlgmr.msra.gmra.mrb[12].mxu1 %vm482_vm3, %v844_v42 }
 0x37f   : > { %1307 = vmatprep.mubr.msk.bf16.mxu1 %vm1750_vm1, %v1749_v8 }
 0x439   : > { %v523_v43 = vpop.f32.mrb[0].mxu1 }
 0x43a   : > { %v1259_v44 = vpop.f32.mrb[1].mxu1  ;;  %v529_v45 = vsel %vm482_vm3, %v523_v43, -inf }
 0x43b   : > { %530 = vmax.xlane.f32.xlu1 %v529_v45  ;;  %v526_v46 = vpop.f32.mrb[2].mxu1 }
 0x43c   : > { %v1260_v47 = vpop.f32.mrb[3].mxu1 }
 0x441   : > { %v641_v48 = vpop.f32.mrb[4].mxu1 }
 0x442   : > { %v1271_v49 = vpop.f32.mrb[5].mxu1  ;;  %v647_v50 = vsel %vm482_vm3, %v641_v48, -inf }
 0x443   : > { %648 = vmax.xlane.f32.xlu0 %v647_v50  ;;  %v644_v51 = vpop.f32.mrb[6].mxu1 }
 0x444   : > { %v1272_v52 = vpop.f32.mrb[7].mxu1 }
 0x449   : > { %v764_v53 = vpop.f32.mrb[8].mxu1 }
 0x44a   : > { %v1283_v54 = vpop.f32.mrb[9].mxu1  ;;  %v770_v55 = vsel %vm482_vm3, %v764_v53, -inf }
 0x44b   : > { %771 = vmax.xlane.f32.xlu1 %v770_v55  ;;  %v767_v56 = vpop.f32.mrb[10].mxu1  ;;  %v1442_v55 = vld [vmem:[#allocation13] sm:$0xff]  }
 0x44c   : > { %v1284_v57 = vpop.f32.mrb[11].mxu1  ;;  %1304 = vmatpush3.bf16.msra.mxu1 %v1442_v55 }
 0x44d   : > { %v1443_v57 = vld [vmem:[#allocation13 + $0x8] sm:$0xff]   ;;  %1305 = vmatprep.subr.bf16.mxu1 %v1749_v8 }
 0x450   : > { %1306 = vmatpush3.bf16.msra.mxu1 %v1443_v57 }
 0x451   : > { %v887_v58 = vpop.f32.mrb[12].mxu1 }
 0x452   : > { %v1295_v59 = vpop.f32.mrb[13].mxu1  ;;  %v893_v60 = vsel %vm482_vm3, %v887_v58, -inf }
 0x453   : > { %894 = vmax.xlane.f32.xlu0 %v893_v60  ;;  %v890_v61 = vpop.f32.mrb[14].mxu1 }
 0x454   : > { %v1296_v62 = vpop.f32.mrb[15].mxu1 }
 0x4c8   : > { %v531_v63 = vpop.xlane.xlu1 %530 }
 0x4c9   : > { %v532_v1 = vsub.f32 %v523_v43, %v531_v63 }
 0x4cb   : > { %v533_v2 = vmul.f32 1.442695, %v532_v1 }
 0x4cd   : > { %1446 = vpow2.f32 %v533_v2 }
 0x4d0   : > { %v649_v3 = vpop.xlane.xlu0 %648 }
 0x4d1   : > { %v650_v4 = vsub.f32 %v641_v48, %v649_v3 }
 0x4d3   : > { %v651_v5 = vmul.f32 1.442695, %v650_v4 }
 0x4d5   : > { %1448 = vpow2.f32 %v651_v5 }
 0x4d7   : > { %v1447_v6 = vpop.eup %1446 }
 0x4d8   : > { %v535_v7 = vsel %vm482_vm3, %v1447_v6, 0.0  ;;  %v772_v16 = vpop.xlane.xlu1 %771 }
 0x4d9   : > { %536 = vadd.xlane.f32.xlu1 %v535_v7  ;;  %v773_v17 = vsub.f32 %v764_v53, %v772_v16  ;;  %v1214_v7 = vld [vmem:[#allocation15] ss:$0 sm:$0xff] }
 0x4db   : > { %v774_v18 = vmul.f32 1.442695, %v773_v17 }
 0x4df   : > { %v1449_v9 = vpop.eup %1448 }
 0x4e0   : > { %v895_v10 = vpop.xlane.xlu0 %894  ;;  %v653_v11 = vsel %vm482_vm3, %v1449_v9, 0.0 }
 0x4e1   : > { %v896_v12 = vsub.f32 %v887_v58, %v895_v10  ;;  %654 = vadd.xlane.f32.xlu0 %v653_v11 }
 0x4e3   : > { %v897_v13 = vmul.f32 1.442695, %v896_v12 }
 0x4e5   : > { %1450 = vpow2.f32 %v897_v13 }
 0x4e6   : > { %1452 = vpow2.f32 %v774_v18 }
 0x4ea   : > { %541 = vrot.lane.b32.xlu1 %v2100_v29, %s1758_s10  ;;  %s2171_s10 = scalar_lea.hbm %s2223_s7, %s1219_s18 }
 0x4ef   : > { %v1451_v14 = vpop.eup %1450 }
 0x4f0   : > { %v899_v15 = vsel %vm482_vm3, %v1451_v14, 0.0  ;;  %v1453_v19 = vpop.eup %1452 }
 0x4f1   : > { %900 = vadd.xlane.f32.xlu0 %v899_v15  ;;  %v776_v20 = vsel %vm482_vm3, %v1453_v19, 0.0 }
 0x507   : > { %659 = vrot.lane.b32.xlu0 %v2098_v27, %s1759_s15  ;;  %s1765_s15 = smov [#allocation16]  }
 0x50e   : > { %777 = vadd.xlane.f32.xlu1 %v776_v20 }
 0x51f   : > { %782 = vrot.lane.b32.xlu1 %v2105_v30, %s1760_s16  ;;  %s1664_s16 = sshll.u32 %s1765_s15, 4  ;;  %s1665_s16 = int_to_ptr.vmem [resolvable:$false] %s1664_s16 }
 0x520   : > { %p1667_p1 = scmp.lt.s32.totalorder %s2173_s19, %s1665_s16 }
 0x523   : > { %905 = vrot.lane.b32.xlu1 %v2109_v31, %s1761_s29  ;;  %s1666_s29 = scalar_lea.vmem %s1665_s16, 256 }
 0x524   : > { %p1668_p3 = scmp.lt.s32.totalorder %s1666_s29, %s1660_s17 }
 0x526   : > { %p1669_p2 = por %p1668_p3, %p1667_p1 }
 0x528   : > { %p1670_p0 = pnand %p1669_p2, %p1663_p13 }
 0x566   : > { %v537_v21 = vpop.xlane.xlu1 %536 }
 0x567   : > { %1454 = vrcp.f32 %v537_v21 }
 0x56a   : > { %v542_v22 = vpop.permute.xlu1 %541 }
 0x56b   : > { %v548_v23 = vsel %vm546_vm4, %v542_v22, 0 }
 0x56c   : > { %1262 = vmatpush3.bf16.msra.mxu0 %v548_v23 }
 0x56d   : > { %1273 = vmatprep.subr.bf16.mxu0 %v1749_v8 }
 0x56e   : > { %v655_v25 = vpop.xlane.xlu0 %654 }
 0x56f   : > { %1456 = vrcp.f32 %v655_v25 }
 0x571   : > { %v1455_v24 = vpop.eup %1454 }
 0x572   : > { %v539_v26 = vmul.f32 %v1455_v24, %v1447_v6 }
 0x574   : > { %v540_v27 = vpack.c.bf16 %v539_v26, %v539_v26 }
 0x576   : > { %1264 = vmatmul.mubr.msk.bf16.vlgmr.msra.gmra.mrb[4].mxu0 %vm482_vm3, %v540_v27 }
 0x577   : > { %1275 = vmatprep.mubr.msk.bf16.mxu0 %vm1750_vm1, %v1749_v8 }
 0x579   : > { %v1457_v28 = vpop.eup %1456 }
 0x57a   : > { %v657_v30 = vmul.f32 %v1457_v28, %v1449_v9 }
 0x57c   : > { %v658_v33 = vpack.c.bf16 %v657_v30, %v657_v30 }
 0x57e   : > { %v901_v29 = vpop.xlane.xlu0 %900 }
 0x582   : > { %v660_v31 = vpop.permute.xlu0 %659 }
 0x583   : > { %v665_v32 = vsel %vm546_vm4, %v660_v31, 0 }
 0x584   : > { %1274 = vmatpush3.bf16.msra.mxu0 %v665_v32 }
 0x585   : > { %1285 = vmatprep.subr.bf16.mxu0 %v1749_v8 }
 0x587   : > { %1276 = vmatmul.mubr.msk.bf16.vlgmr.msra.gmra.mrb[8].mxu0 %vm482_vm3, %v658_v33 }
 0x588   : > { %1287 = vmatprep.mubr.msk.bf16.mxu0 %vm1750_vm1, %v1749_v8 }
 0x59b   : > { %v778_v34 = vpop.xlane.xlu1 %777 }
 0x59c   : > { %1458 = vrcp.f32 %v778_v34 }
 0x59d   : > { %1460 = vrcp.f32 %v901_v29 }
 0x59f   : > { %v783_v35 = vpop.permute.xlu1 %782 }
 0x5a0   : > { %v788_v36 = vsel %vm546_vm4, %v783_v35, 0 }
 0x5a1   : > { %1286 = vmatpush3.bf16.msra.mxu0 %v788_v36 }
 0x5a2   : > { %1297 = vmatprep.subr.bf16.mxu0 %v1749_v8 }
 0x5a3   : > { %v906_v39 = vpop.permute.xlu1 %905 }
 0x5a4   : > { %v911_v42 = vsel %vm546_vm4, %v906_v39, 0 }
 0x5a6   : > { %v1459_v37 = vpop.eup %1458 }
 0x5a7   : > { %v780_v38 = vmul.f32 %v1459_v37, %v1453_v19  ;;  %v1461_v41 = vpop.eup %1460 }
 0x5a8   : > { %v903_v43 = vmul.f32 %v1461_v41, %v1451_v14 }
 0x5a9   : > { %v781_v40 = vpack.c.bf16 %v780_v38, %v780_v38 }
 0x5aa   : > { %v904_v44 = vpack.c.bf16 %v903_v43, %v903_v43 }
 0x5ab   : > { %1288 = vmatmul.mubr.msk.bf16.vlgmr.msra.gmra.mrb[12].mxu0 %vm482_vm3, %v781_v40 }
 0x5ac   : > { %1298 = vmatpush3.bf16.msra.mxu0 %v911_v42  ;;  %1299 = vmatprep.mubr.msk.bf16.mxu0 %vm1750_vm1, %v1749_v8 }
 0x5b3   : > { %1300 = vmatmul.mubr.msk.bf16.vlgmr.msra.gmra.mrb[16].mxu0 %vm482_vm3, %v904_v44 }
 0x649   : > { %v584_v45 = vpop.f32.mrb[4].mxu0 }
 0x64a   : > { %v590_v46 = vpack.c.bf16 %v584_v45, %v584_v45  ;;  %v1265_v47 = vpop.f32.mrb[5].mxu0 }
 0x64b   : > { %v587_v48 = vpop.f32.mrb[6].mxu0 }
 0x64c   : > { %592 = vst.msk [vmem:[#allocation3] sm:$0xf] %vm591_vm5, %v590_v46  ;;  %v1266_v49 = vpop.f32.mrb[7].mxu0 }
 0x65a   : > { %v701_v50 = vpop.f32.mrb[8].mxu0 }
 0x65b   : > { %v1222_v51 = vpack.c.bf16 %v701_v50, %v701_v50  ;;  %v1277_v52 = vpop.f32.mrb[9].mxu0 }
 0x65c   : > { %v704_v53 = vpop.f32.mrb[10].mxu0 }
 0x65d   : > { %711 = vrot.lane.b32.xlu0 %v1222_v51, %s1762_s12  ;;  %v1278_v54 = vpop.f32.mrb[11].mxu0 }
 0x67e   : > { %v824_v56 = vpop.f32.mrb[12].mxu0 }
 0x67f   : > { %v1223_v58 = vpack.c.bf16 %v824_v56, %v824_v56  ;;  %v1289_v59 = vpop.f32.mrb[13].mxu0 }
 0x680   : > { %v827_v60 = vpop.f32.mrb[14].mxu0 }
 0x681   : > { %834 = vrot.lane.b32.xlu1 %v1223_v58, %s1763_s8  ;;  %v1290_v61 = vpop.f32.mrb[15].mxu0 }
 0x686   : > { %v947_v62 = vpop.f32.mrb[16].mxu0 }
 0x687   : > { %v1224_v63 = vpack.c.bf16 %v947_v62, %v947_v62  ;;  %v1301_v1 = vpop.f32.mrb[17].mxu0 }
 0x688   : > { %v950_v2 = vpop.f32.mrb[18].mxu0 }
 0x689   : > { %957 = vrot.lane.b32.xlu0 %v1224_v63, %s1764_s22  ;;  %v1302_v3 = vpop.f32.mrb[19].mxu0 }
 0x6cf   : > { %v712_v4 = vpop.permute.xlu0 %711 }
 0x6d0   : > { %715 = vst.msk [vmem:[#allocation3] sm:$0xf] %vm714_vm6, %v712_v4 }
 0x6f3   : > { %v835_v5 = vpop.permute.xlu1 %834 }
 0x6f4   : > { %838 = vst.msk [vmem:[#allocation3] sm:$0xf] %vm837_vm7, %v835_v5 }
 0x6fb   : > { %v958_v8 = vpop.permute.xlu0 %957 }
 0x6fc   : > { %961 = vst.msk [vmem:[#allocation3] sm:$0xf] %vm960_vm8, %v958_v8 }
 0x703   : > { %v962_v6 = vld [vmem:[#allocation3] sm:$0xf] }
 0x704   : > { %1308 = vmatmul.mubr.msk.bf16.vlgmr.msra.gmra.mrb[16].mxu1 %vm377_vm0, %v962_v6 }
 0x7d7   : > { %v1023_v9 = vpop.f32.mrb[16].mxu1 }
 0x7d8   : > { %v1024_v10 = vadd.f32 %v1214_v7, %v1023_v9  ;;  %v1309_v11 = vpop.f32.mrb[17].mxu1 }
 0x7d9   : > { %v1026_v12 = vpop.f32.mrb[18].mxu1 }
 0x7da   : > { %v1030_v13 = vadd.f32 %v1024_v10, %v2081_v0  ;;  %v1310_v14 = vpop.f32.mrb[19].mxu1 }
 0x7dc   : > { %1031 = vst.msk [vmem:[%s372_s28] sm:$0xff] %vm377_vm0, %v1030_v13 }
 0x7dd   : > { %1673 = shalt.err (!%p1670_p0)
}
 0x7de   : > { %s1674_s13 = scalar_lea.hbm %s2171_s10, 128  ;;  %s1678_s22 = scalar_lea.hbm %s2223_s7, 256 }
 0x7df   : > { %p1675_p10 = scmp.ne.s32.totalorder %s2171_s10, %s1674_s13  ;;  %p1679_p8 = scmp.lt.u32.totalorder %s2171_s10, %s2223_s7 }
 0x7e0   : > { %p1680_p5 = scmp.lt.u32.totalorder %s1678_s22, %s1674_s13  ;;  %p1682_p6 = scmp.lt.u32.totalorder %s1674_s13, %s2171_s10 }
 0x7e1   : > { %p1676_p11 = pnand %p1675_p10, %p2243_p9 }
 0x7e2   : > { %p1681_p7 = por %p1680_p5, %p1679_p8 }
 0x7e3   : > { %p1677_p12 = pneg %p1676_p11 }
 0x7e4   : > { %p1683_p4 = por %p1682_p6, %p1681_p7 }
 0x7e6   : > { %p1684_p13 = pnand %p1683_p4, %p1677_p12 }
 0x7e8   : > { %1687 = shalt.err (!%p1684_p13)
}
 0x7e9   : > { %1337 = dma.vmem_to_hbm [thread:$0]  (%p2243_p9), %s2173_s19, 128, %s2171_s10, %s1033_s30  }
 0x7ea PF: > { %s1058_s20 = sand.u32 1, %s1726_s24   ;;  %p2244_p1 = scmp.ne.s32.totalorder %s2234_s14, 0 }
 0x7eb   : > { %p2245_p3 = scmp.ge.s32.totalorder %s1738_s27, 2  ;;  %s1059_s23 = scalar_lea.sflag [#allocation6], %s1058_s20 }
 0x7ed   : > { %p1363_p2 = pnand %p2245_p3, %p2244_p1 }
 0x7ef   : > { %1721 = dma.done.wait (!%p1363_p2), %s1059_s23, 128  }
 0x7f0   : > { %1723 = vsyncadd (!%p1363_p2), %s1059_s23, 4294967168  ;;  %p23_p0 = scmp.ge.s32.totalorder %s1983_s11, 4   ;;  %s2246_s24 = smov %s1730_s25 }
 0x7f1   : > { %s2247_s25 = smov %s1734_s26  ;;  %s2248_s26 = smov %s1994_s21 }
 0x7f2   : > { %s2249_s27 = smov %s1983_s11  ;;  %25 = sbr.rel (!%p23_p0) target bundleno = 8 (0x8), region = 117 }
 0x7f9   :  { %1064 = vsyncpa [#allocation5], 1 }
 0x7fa   :  { %1066 = vsyncpa [#allocation5 + $0x1], 1 }
 0x7fb   :  { %1067 = vsyncpa [#allocation8], 1 }
 0x7fc   :  { %1068 = vsyncpa [#allocation11], 1 }
 0x7fd   :  { %1069 = vsyncpa [#allocation14], 1 }
 0x7fe   :  { %1070 = vsyncpa [#allocation6], 1 }
 0x7ff   :  { %1072 = vsyncpa [#allocation6 + $0x1], 1 }

</bundles_post_ra>
